<compile_context>
chip_gen: v7x
topology: tpu7x:2x2x1
jax: 0.10.0
libtpu: 0.0.40
codegen_flags: <defaults>
</compile_context>

<pallas_src>
import jax
import jax.numpy as jnp
from jax import lax
from jax.experimental import pallas as pl
from jax.experimental.pallas import tpu as pltpu

# Small, forward-consistent stand-in sizes.
B, S, H, V = 2, 8, 32, 128
NH = 16            # the torch code hard-codes 16 heads
NL = 3             # layers 21, 22, 23 with weights [1, 1, 1]
MASK_TOKEN_ID = 5
ROWS = 8           # padded batch rows == sublanes of the single output vreg


def fused_kernel(h_ref, w_ref, const_ref, attn_ref, sc_ref, out_ref):
    """Fused MLM-head classification + CE loss + text-span attention reduction.

    h_ref    : (ROWS, H)        VMEM  hidden state at [MASK] (rows >= bsz are padding)
    w_ref    : (H, V)           VMEM  MLM head weight
    const_ref: (ROWS, V)        VMEM  row0 = bias, row1 = positive mask, row2 = negative mask
    attn_ref : (bsz, S*NL, NH*S) VMEM lane-dense attention: [b, q*NL + l, h*S + k]
    sc_ref   : (3*bsz,)         SMEM  [mask_pos(bsz), len_text(bsz), labels(bsz)]
    out_ref  : (ROWS, NH*S)     VMEM  lane0/1 = cls (neg,pos), lane2 = batch_attention,
                                      lane3 = loss (row 0), rest zero
    """
    bsz = attn_ref.shape[0]
    nrows = h_ref.shape[0]
    lanes = out_ref.shape[1]

    bias = const_ref[0:1, :]          # (1, V)
    pos_m = const_ref[1:2, :]
    neg_m = const_ref[2:3, :]

    # ---- MLM head (single MXU pass) + log_softmax over vocab ----------------
    logits = jnp.dot(h_ref[...], w_ref[...],
                     preferred_element_type=jnp.float32) + bias          # (ROWS, V)
    m = jnp.max(logits, axis=-1, keepdims=True)
    lse = m + jnp.log(jnp.sum(jnp.exp(logits - m), axis=-1, keepdims=True))
    logp = logits - lse

    # positive / negative token-id sums (mask_num == 1, so the sum over the
    # mask dimension of the torch code is the identity).
    pos = jnp.sum(logp * pos_m, axis=-1, keepdims=True)                   # (ROWS, 1)
    neg = jnp.sum(logp * neg_m, axis=-1, keepdims=True)                   # (ROWS, 1)

    # softmax over cat([negative, positive]) -- exact divide (no approx recip).
    m2 = jnp.maximum(neg, pos)
    e_neg = jnp.exp(neg - m2)
    e_pos = jnp.exp(pos - m2)
    denom = e_neg + e_pos
    p_neg = e_neg / denom
    p_pos = e_pos / denom

    # torch.nn.CrossEntropyLoss re-applies log_softmax to the already-softmaxed
    # probabilities -- intentional, faithful replication of the torch module.
    m3 = jnp.maximum(p_neg, p_pos)
    lse3 = m3 + jnp.log(jnp.exp(p_neg - m3) + jnp.exp(p_pos - m3))
    lp_neg = p_neg - lse3
    lp_pos = p_pos - lse3

    row1 = lax.broadcasted_iota(jnp.int32, (nrows, 1), 0)                 # (ROWS, 1)

    # labels come from SMEM; build the per-row label column in-kernel.
    lab_i = jnp.zeros((nrows, 1), jnp.int32)
    for b in range(bsz):                                    # static, tiny batch
        lab_i = lab_i + jnp.where(row1 == b, sc_ref[2 * bsz + b], 0)
    lab = lab_i.astype(jnp.float32)
    nll = -((1.0 - lab) * lp_neg + lab * lp_pos)                          # (ROWS, 1)
    valid = (row1 < bsz).astype(jnp.float32)
    loss = jnp.sum(nll * valid, axis=0, keepdims=True) * (1.0 / bsz)      # (1, 1)

    # ---- batch_attention: 3 contiguous query rows per example + key window --
    # attn_ref[b, q*NL + l, h*S + k] == attention[layer l][b][head h][q][k].
    k_idx = lax.broadcasted_iota(jnp.int32, (1, lanes), 1) & (S - 1)      # (1, NH*S)
    ba_col = jnp.zeros((nrows, 1), jnp.float32)
    for b in range(bsz):                                    # static, tiny batch
        mp = sc_ref[b]                                      # SMEM scalars
        lt = sc_ref[bsz + b]
        hi = mp - 3
        lo = hi - lt
        # Replicate Python negative-index wrap of the torch slice [lo:hi]
        # (covers the -S <= lo,hi < S cases; outside that is degenerate input).
        lo = jnp.where(lo < 0, lo + S, lo)
        hi = jnp.where(hi < 0, hi + S, hi)
        sel = ((k_idx >= lo) & (k_idx < hi)).astype(jnp.float32)          # (1, NH*S)
        rows = attn_ref[b, pl.ds(mp * NL, NL), :]                         # (NL, NH*S)
        s_b = jnp.sum(rows * sel, keepdims=True)                          # (1, 1)
        ba_col = ba_col + jnp.where(row1 == b, s_b, 0.0)
    ba_col = ba_col * (1.0 / (NH * NL))

    # ---- single lane-dense output slab: one unmasked full-vreg store --------
    col = lax.broadcasted_iota(jnp.int32, (nrows, lanes), 1)
    slab = (jnp.where(col == 0, p_neg, 0.0)
            + jnp.where(col == 1, p_pos, 0.0)
            + jnp.where(col == 2, ba_col, 0.0)
            + jnp.where(col == 3, loss, 0.0))
    out_ref[...] = slab


def _vmem():
    return pl.BlockSpec(memory_space=pltpu.MemorySpace.VMEM)


def _smem():
    return pl.BlockSpec(memory_space=pltpu.MemorySpace.SMEM)


def bert_prompt_tune_forward(input_ids, attention_mask, labels, len_text, params):
    """JAX wrapper mirroring BertPromptTune.forward.

    TODO(synk): the pretrained RobertaForMaskedLM encoder has no Pallas
    equivalent; it is replaced by a deterministic embedding stand-in and
    synthetic softmax-normalized attention maps, so attention_mask is unused.
    """
    del attention_mask
    emb = params["emb"]            # (V, H)
    w_head = params["w_head"]      # (H, V)
    const = params["const"]        # (ROWS, V) bias / pos-mask / neg-mask rows
    attn_ld = params["attn_ld"]    # (B, S*NL, NH*S) lane-dense attention probs

    bsz = input_ids.shape[0]
    nrows = max(ROWS, ((bsz + 7) // 8) * 8)

    # One [MASK] per example (as the torch attention loop assumes).  A row with
    # no [MASK] resolves to position 0 (argmax behavior), same caveat as before.
    mask_pos = jnp.argmax((input_ids == MASK_TOKEN_ID).astype(jnp.int32),
                          axis=1).astype(jnp.int32)
    tok_at_mask = jnp.take_along_axis(input_ids, mask_pos[:, None], axis=1)[:, 0]
    idx = jnp.zeros((nrows,), jnp.int32).at[:bsz].set(tok_at_mask)
    h_pad = emb[idx]                                       # (nrows, H) stand-in encoder @ [MASK]

    # mask positions, text lengths and labels share one 1-D SMEM vector.
    scalars = jnp.concatenate([mask_pos,
                               len_text.astype(jnp.int32),
                               labels.astype(jnp.int32)]).astype(jnp.int32)

    out = pl.pallas_call(
        fused_kernel,
        out_shape=jax.ShapeDtypeStruct((nrows, NH * S), jnp.float32),
        in_specs=[_vmem(), _vmem(), _vmem(), _vmem(), _smem()],
        out_specs=_vmem(),
    )(h_pad, w_head, const, attn_ld, scalars)

    cls_logits = out[:bsz, 0:2]
    batch_attention = out[:bsz, 2]
    loss = out[0, 3]
    return cls_logits, loss, batch_attention


if __name__ == "__main__":
    key = jax.random.PRNGKey(0)
    k_emb, k_w, k_b, k_attn, k_ids = jax.random.split(key, 5)

    positive_token_ids = jnp.array([3, 17, 42], dtype=jnp.int32)
    negative_token_ids = jnp.array([7, 19, 55], dtype=jnp.int32)

    emb = 0.02 * jax.random.normal(k_emb, (V, H), jnp.float32)
    w_head = 0.02 * jax.random.normal(k_w, (H, V), jnp.float32)
    b_head = 0.02 * jax.random.normal(k_b, (V,), jnp.float32)

    # Stacked constants: row0 = MLM bias, row1 = positive mask, row2 = negative mask.
    const = jnp.zeros((ROWS, V), jnp.float32)
    const = const.at[0].set(b_head)
    const = const.at[1, positive_token_ids].set(1.0)
    const = const.at[2, negative_token_ids].set(1.0)

    # Synthetic "bert" attention for layers 21,22,23, generated directly in a
    # lane-dense-friendly layout (B, q, l, h, k) -> reshape (no transpose copy).
    attn5 = jax.nn.softmax(
        jax.random.normal(k_attn, (B, S, NL, NH, S), jnp.float32), axis=-1)
    attn_ld = attn5.reshape(B, S * NL, NH * S)

    params = {"emb": emb, "w_head": w_head, "const": const, "attn_ld": attn_ld}

    # inputs: exactly one [MASK] per row; other ids in [10, V) never collide with id 5
    input_ids = jax.random.randint(k_ids, (B, S), 10, V).astype(jnp.int32)
    mask_pos = jnp.array([6, 7], dtype=jnp.int32)
    input_ids = input_ids.at[jnp.arange(B), mask_pos].set(MASK_TOKEN_ID)
    attention_mask = jnp.ones((B, S), dtype=jnp.int32)
    labels = jnp.array([1, 0], dtype=jnp.int32)
    len_text = jnp.array([2, 3], dtype=jnp.int32)

    fwd = jax.jit(bert_prompt_tune_forward)
    cls_logits, loss, batch_attention = fwd(input_ids, attention_mask, labels,
                                            len_text, params)
    jax.block_until_ready((cls_logits, loss, batch_attention))

    # -------- pure-JAX reference check --------
    h_mask = emb[input_ids[jnp.arange(B), mask_pos]]
    logits_ref = h_mask @ w_head + b_head[None, :]
    logp_ref = jax.nn.log_softmax(logits_ref, axis=-1)
    pos_ref = jnp.sum(logp_ref[:, positive_token_ids], axis=-1, keepdims=True)
    neg_ref = jnp.sum(logp_ref[:, negative_token_ids], axis=-1, keepdims=True)
    cls_ref = jax.nn.softmax(jnp.concatenate([neg_ref, pos_ref], axis=1), axis=1)
    lab_oh = jax.nn.one_hot(labels, 2, dtype=jnp.float32)
    loss_ref = -jnp.mean(
        jnp.sum(jax.nn.log_softmax(cls_ref, axis=-1) * lab_oh, axis=-1))
    ba_ref = []
    for i in range(B):
        mp, lt = int(mask_pos[i]), int(len_text[i])
        lo, hi = mp - 3 - lt, mp - 3
        tot = 0.0
        for l in range(NL):
            ta = 0.0
            for j in range(NH):
                ta += float(jnp.sum(attn5[i, mp, l, j, lo:hi]))
            tot += ta / 16.0
        ba_ref.append(tot / 3.0)
    ba_ref = jnp.array(ba_ref, jnp.float32)

    assert jnp.allclose(cls_logits, cls_ref, rtol=1e-5, atol=1e-5)
    assert jnp.allclose(loss, loss_ref, rtol=1e-5, atol=1e-5)
    assert jnp.allclose(batch_attention, ba_ref, rtol=1e-5, atol=1e-5)

    print("KERNEL_OK")
</pallas_src>

<mosaic_0001>
module attributes {stable_mosaic.version = 11 : i64} {
  func.func @fused_kernel(%arg0: memref<8x32xf32, #tpu.memory_space<vmem>>, %arg1: memref<32x128xf32, #tpu.memory_space<vmem>>, %arg2: memref<8x128xf32, #tpu.memory_space<vmem>>, %arg3: memref<2x24x128xf32, #tpu.memory_space<vmem>>, %arg4: memref<6xi32, #tpu.memory_space<smem>>, %arg5: memref<8x128xf32, #tpu.memory_space<vmem>>) attributes {dimension_semantics = [], scalar_prefetch = 0 : i64, scratch_operands = 0 : i64, tpu.core_type = #tpu.core_type<tc>} {
    %c0 = arith.constant 0 : index
    %c0_0 = arith.constant 0 : index
    %0 = vector.load %arg2[%c0, %c0_0] : memref<8x128xf32, #tpu.memory_space<vmem>>, vector<1x128xf32>
    %c1 = arith.constant 1 : index
    %c0_1 = arith.constant 0 : index
    %1 = vector.load %arg2[%c1, %c0_1] : memref<8x128xf32, #tpu.memory_space<vmem>>, vector<1x128xf32>
    %c2 = arith.constant 2 : index
    %c0_2 = arith.constant 0 : index
    %2 = vector.load %arg2[%c2, %c0_2] : memref<8x128xf32, #tpu.memory_space<vmem>>, vector<1x128xf32>
    %c0_3 = arith.constant 0 : index
    %c0_4 = arith.constant 0 : index
    %3 = vector.load %arg0[%c0_3, %c0_4] : memref<8x32xf32, #tpu.memory_space<vmem>>, vector<8x32xf32>
    %c0_5 = arith.constant 0 : index
    %c0_6 = arith.constant 0 : index
    %4 = vector.load %arg1[%c0_5, %c0_6] : memref<32x128xf32, #tpu.memory_space<vmem>>, vector<32x128xf32>
    %cst = arith.constant dense<0.000000e+00> : vector<8x128xf32>
    %5 = tpu.matmul %3, %4, %cst {dimension_numbers = #tpu.dot_dimension_numbers<[1], [0], [0], [1], [0, 0, 1, 1], [], []>} : vector<8x32xf32>, vector<32x128xf32>, vector<8x128xf32> -> vector<8x128xf32>
    %6 = vector.broadcast %0 : vector<1x128xf32> to vector<8x128xf32>
    %7 = arith.addf %5, %6 : vector<8x128xf32>
    %cst_7 = arith.constant dense<0xFF800000> : vector<8xf32>
    %8 = vector.multi_reduction <maximumf>, %7, %cst_7 [1] : vector<8x128xf32> to vector<8xf32>
    %9 = vector.shape_cast %8 : vector<8xf32> to vector<8x1xf32>
    %10 = vector.broadcast %9 : vector<8x1xf32> to vector<8x128xf32>
    %11 = arith.subf %7, %10 : vector<8x128xf32>
    %12 = math.exp %11 : vector<8x128xf32>
    %cst_8 = arith.constant dense<0.000000e+00> : vector<8xf32>
    %13 = vector.multi_reduction <add>, %12, %cst_8 [1] : vector<8x128xf32> to vector<8xf32>
    %14 = vector.shape_cast %13 : vector<8xf32> to vector<8x1xf32>
    %15 = math.log %14 : vector<8x1xf32>
    %16 = arith.addf %9, %15 : vector<8x1xf32>
    %17 = vector.broadcast %16 : vector<8x1xf32> to vector<8x128xf32>
    %18 = arith.subf %7, %17 : vector<8x128xf32>
    %19 = vector.broadcast %1 : vector<1x128xf32> to vector<8x128xf32>
    %20 = arith.mulf %18, %19 : vector<8x128xf32>
    %cst_9 = arith.constant dense<0.000000e+00> : vector<8xf32>
    %21 = vector.multi_reduction <add>, %20, %cst_9 [1] : vector<8x128xf32> to vector<8xf32>
    %22 = vector.shape_cast %21 : vector<8xf32> to vector<8x1xf32>
    %23 = vector.broadcast %2 : vector<1x128xf32> to vector<8x128xf32>
    %24 = arith.mulf %18, %23 : vector<8x128xf32>
    %cst_10 = arith.constant dense<0.000000e+00> : vector<8xf32>
    %25 = vector.multi_reduction <add>, %24, %cst_10 [1] : vector<8x128xf32> to vector<8xf32>
    %26 = vector.shape_cast %25 : vector<8xf32> to vector<8x1xf32>
    %27 = arith.maximumf %26, %22 : vector<8x1xf32>
    %28 = arith.subf %26, %27 : vector<8x1xf32>
    %29 = math.exp %28 : vector<8x1xf32>
    %30 = arith.subf %22, %27 : vector<8x1xf32>
    %31 = math.exp %30 : vector<8x1xf32>
    %32 = arith.addf %29, %31 : vector<8x1xf32>
    %33 = arith.divf %29, %32 : vector<8x1xf32>
    %34 = arith.divf %31, %32 : vector<8x1xf32>
    %35 = arith.maximumf %33, %34 : vector<8x1xf32>
    %36 = arith.subf %33, %35 : vector<8x1xf32>
    %37 = math.exp %36 : vector<8x1xf32>
    %38 = arith.subf %34, %35 : vector<8x1xf32>
    %39 = math.exp %38 : vector<8x1xf32>
    %40 = arith.addf %37, %39 : vector<8x1xf32>
    %41 = math.log %40 : vector<8x1xf32>
    %42 = arith.addf %35, %41 : vector<8x1xf32>
    %43 = arith.subf %33, %42 : vector<8x1xf32>
    %44 = arith.subf %34, %42 : vector<8x1xf32>
    %45 = tpu.iota {dimensions = array<i32: 0>} : vector<8x1xi32>
    %c0_i32 = arith.constant 0 : i32
    %46 = vector.broadcast %c0_i32 : i32 to vector<8x1xi32>
    %c0_i32_11 = arith.constant 0 : i32
    %47 = vector.broadcast %c0_i32_11 : i32 to vector<8x1xi32>
    %48 = arith.cmpi eq, %45, %47 : vector<8x1xi32>
    %c4 = arith.constant 4 : index
    %49 = memref.load %arg4[%c4] : memref<6xi32, #tpu.memory_space<smem>>
    %c0_i32_12 = arith.constant 0 : i32
    %50 = vector.broadcast %49 : i32 to vector<8x1xi32>
    %51 = vector.broadcast %c0_i32_12 : i32 to vector<8x1xi32>
    %52 = arith.select %48, %50, %51 : vector<8x1xi1>, vector<8x1xi32>
    %53 = arith.addi %46, %52 : vector<8x1xi32>
    %c1_i32 = arith.constant 1 : i32
    %54 = vector.broadcast %c1_i32 : i32 to vector<8x1xi32>
    %55 = arith.cmpi eq, %45, %54 : vector<8x1xi32>
    %c5 = arith.constant 5 : index
    %56 = memref.load %arg4[%c5] : memref<6xi32, #tpu.memory_space<smem>>
    %c0_i32_13 = arith.constant 0 : i32
    %57 = vector.broadcast %56 : i32 to vector<8x1xi32>
    %58 = vector.broadcast %c0_i32_13 : i32 to vector<8x1xi32>
    %59 = arith.select %55, %57, %58 : vector<8x1xi1>, vector<8x1xi32>
    %60 = arith.addi %53, %59 : vector<8x1xi32>
    %61 = arith.sitofp %60 : vector<8x1xi32> to vector<8x1xf32>
    %cst_14 = arith.constant 1.000000e+00 : f32
    %62 = vector.broadcast %cst_14 : f32 to vector<8x1xf32>
    %63 = arith.subf %62, %61 : vector<8x1xf32>
    %64 = arith.mulf %63, %43 : vector<8x1xf32>
    %65 = arith.mulf %61, %44 : vector<8x1xf32>
    %66 = arith.addf %64, %65 : vector<8x1xf32>
    %cst_15 = arith.constant 0.000000e+00 : f32
    %67 = vector.broadcast %cst_15 : f32 to vector<8x1xf32>
    %68 = arith.subf %67, %66 : vector<8x1xf32>
    %c2_i32 = arith.constant 2 : i32
    %69 = vector.broadcast %c2_i32 : i32 to vector<8x1xi32>
    %70 = arith.cmpi slt, %45, %69 : vector<8x1xi32>
    %71 = arith.extui %70 : vector<8x1xi1> to vector<8x1xi32>
    %72 = arith.sitofp %71 : vector<8x1xi32> to vector<8x1xf32>
    %73 = arith.mulf %68, %72 : vector<8x1xf32>
    %cst_16 = arith.constant dense<0.000000e+00> : vector<1xf32>
    %74 = vector.multi_reduction <add>, %73, %cst_16 [0] : vector<8x1xf32> to vector<1xf32>
    %75 = vector.shape_cast %74 : vector<1xf32> to vector<1x1xf32>
    %cst_17 = arith.constant 5.000000e-01 : f32
    %76 = vector.broadcast %cst_17 : f32 to vector<1x1xf32>
    %77 = arith.mulf %75, %76 : vector<1x1xf32>
    %78 = tpu.iota {dimensions = array<i32: 1>} : vector<1x128xi32>
    %c7_i32 = arith.constant 7 : i32
    %79 = vector.broadcast %c7_i32 : i32 to vector<1x128xi32>
    %80 = arith.andi %78, %79 : vector<1x128xi32>
    %cst_18 = arith.constant 0.000000e+00 : f32
    %81 = vector.broadcast %cst_18 : f32 to vector<8x1xf32>
    %c0_19 = arith.constant 0 : index
    %82 = memref.load %arg4[%c0_19] : memref<6xi32, #tpu.memory_space<smem>>
    %c2_20 = arith.constant 2 : index
    %83 = memref.load %arg4[%c2_20] : memref<6xi32, #tpu.memory_space<smem>>
    %c3_i32 = arith.constant 3 : i32
    %84 = arith.subi %82, %c3_i32 : i32
    %85 = arith.subi %84, %83 : i32
    %c0_i32_21 = arith.constant 0 : i32
    %86 = arith.cmpi slt, %85, %c0_i32_21 : i32
    %c8_i32 = arith.constant 8 : i32
    %87 = arith.addi %85, %c8_i32 : i32
    %88 = arith.select %86, %87, %85 : i32
    %c0_i32_22 = arith.constant 0 : i32
    %89 = arith.cmpi slt, %84, %c0_i32_22 : i32
    %c8_i32_23 = arith.constant 8 : i32
    %90 = arith.addi %84, %c8_i32_23 : i32
    %91 = arith.select %89, %90, %84 : i32
    %92 = vector.broadcast %88 : i32 to vector<1x128xi32>
    %93 = arith.cmpi sge, %80, %92 : vector<1x128xi32>
    %94 = vector.broadcast %91 : i32 to vector<1x128xi32>
    %95 = arith.cmpi slt, %80, %94 : vector<1x128xi32>
    %96 = arith.andi %93, %95 : vector<1x128xi1>
    %97 = arith.extui %96 : vector<1x128xi1> to vector<1x128xi32>
    %98 = arith.sitofp %97 : vector<1x128xi32> to vector<1x128xf32>
    %c3_i32_24 = arith.constant 3 : i32
    %99 = arith.muli %82, %c3_i32_24 : i32
    %c0_25 = arith.constant 0 : index
    %100 = arith.index_cast %99 : i32 to index
    %c0_26 = arith.constant 0 : index
    %101 = vector.load %arg3[%c0_25, %100, %c0_26] : memref<2x24x128xf32, #tpu.memory_space<vmem>>, vector<1x3x128xf32>
    %102 = vector.shape_cast %101 : vector<1x3x128xf32> to vector<3x128xf32>
    %103 = vector.broadcast %98 : vector<1x128xf32> to vector<3x128xf32>
    %104 = arith.mulf %102, %103 : vector<3x128xf32>
    %105 = vector.shape_cast %104 : vector<3x128xf32> to vector<1x3x128xf32>
    %cst_27 = arith.constant dense<0.000000e+00> : vector<1xf32>
    %106 = vector.multi_reduction <add>, %105, %cst_27 [1, 2] : vector<1x3x128xf32> to vector<1xf32>
    %107 = vector.shape_cast %106 : vector<1xf32> to vector<1x1x1xf32>
    %108 = vector.extract %107[0, 0, 0] : f32 from vector<1x1x1xf32>
    %109 = vector.broadcast %108 : f32 to vector<1x1xf32>
    %c0_i32_28 = arith.constant 0 : i32
    %110 = vector.broadcast %c0_i32_28 : i32 to vector<8x1xi32>
    %111 = arith.cmpi eq, %45, %110 : vector<8x1xi32>
    %cst_29 = arith.constant 0.000000e+00 : f32
    %112 = vector.shape_cast %109 : vector<1x1xf32> to vector<1x1xf32>
    %113 = vector.broadcast %112 : vector<1x1xf32> to vector<8x1xf32>
    %114 = vector.broadcast %cst_29 : f32 to vector<8x1xf32>
    %115 = arith.select %111, %113, %114 : vector<8x1xi1>, vector<8x1xf32>
    %116 = arith.addf %81, %115 : vector<8x1xf32>
    %c1_30 = arith.constant 1 : index
    %117 = memref.load %arg4[%c1_30] : memref<6xi32, #tpu.memory_space<smem>>
    %c3 = arith.constant 3 : index
    %118 = memref.load %arg4[%c3] : memref<6xi32, #tpu.memory_space<smem>>
    %c3_i32_31 = arith.constant 3 : i32
    %119 = arith.subi %117, %c3_i32_31 : i32
    %120 = arith.subi %119, %118 : i32
    %c0_i32_32 = arith.constant 0 : i32
    %121 = arith.cmpi slt, %120, %c0_i32_32 : i32
    %c8_i32_33 = arith.constant 8 : i32
    %122 = arith.addi %120, %c8_i32_33 : i32
    %123 = arith.select %121, %122, %120 : i32
    %c0_i32_34 = arith.constant 0 : i32
    %124 = arith.cmpi slt, %119, %c0_i32_34 : i32
    %c8_i32_35 = arith.constant 8 : i32
    %125 = arith.addi %119, %c8_i32_35 : i32
    %126 = arith.select %124, %125, %119 : i32
    %127 = vector.broadcast %123 : i32 to vector<1x128xi32>
    %128 = arith.cmpi sge, %80, %127 : vector<1x128xi32>
    %129 = vector.broadcast %126 : i32 to vector<1x128xi32>
    %130 = arith.cmpi slt, %80, %129 : vector<1x128xi32>
    %131 = arith.andi %128, %130 : vector<1x128xi1>
    %132 = arith.extui %131 : vector<1x128xi1> to vector<1x128xi32>
    %133 = arith.sitofp %132 : vector<1x128xi32> to vector<1x128xf32>
    %c3_i32_36 = arith.constant 3 : i32
    %134 = arith.muli %117, %c3_i32_36 : i32
    %c1_37 = arith.constant 1 : index
    %135 = arith.index_cast %134 : i32 to index
    %c0_38 = arith.constant 0 : index
    %136 = vector.load %arg3[%c1_37, %135, %c0_38] : memref<2x24x128xf32, #tpu.memory_space<vmem>>, vector<1x3x128xf32>
    %137 = vector.shape_cast %136 : vector<1x3x128xf32> to vector<3x128xf32>
    %138 = vector.broadcast %133 : vector<1x128xf32> to vector<3x128xf32>
    %139 = arith.mulf %137, %138 : vector<3x128xf32>
    %140 = vector.shape_cast %139 : vector<3x128xf32> to vector<1x3x128xf32>
    %cst_39 = arith.constant dense<0.000000e+00> : vector<1xf32>
    %141 = vector.multi_reduction <add>, %140, %cst_39 [1, 2] : vector<1x3x128xf32> to vector<1xf32>
    %142 = vector.shape_cast %141 : vector<1xf32> to vector<1x1x1xf32>
    %143 = vector.extract %142[0, 0, 0] : f32 from vector<1x1x1xf32>
    %144 = vector.broadcast %143 : f32 to vector<1x1xf32>
    %c1_i32_40 = arith.constant 1 : i32
    %145 = vector.broadcast %c1_i32_40 : i32 to vector<8x1xi32>
    %146 = arith.cmpi eq, %45, %145 : vector<8x1xi32>
    %cst_41 = arith.constant 0.000000e+00 : f32
    %147 = vector.shape_cast %144 : vector<1x1xf32> to vector<1x1xf32>
    %148 = vector.broadcast %147 : vector<1x1xf32> to vector<8x1xf32>
    %149 = vector.broadcast %cst_41 : f32 to vector<8x1xf32>
    %150 = arith.select %146, %148, %149 : vector<8x1xi1>, vector<8x1xf32>
    %151 = arith.addf %116, %150 : vector<8x1xf32>
    %cst_42 = arith.constant 0.020833334 : f32
    %152 = vector.broadcast %cst_42 : f32 to vector<8x1xf32>
    %153 = arith.mulf %151, %152 : vector<8x1xf32>
    %154 = tpu.iota {dimensions = array<i32: 1>} : vector<8x128xi32>
    %c0_i32_43 = arith.constant 0 : i32
    %155 = vector.broadcast %c0_i32_43 : i32 to vector<8x128xi32>
    %156 = arith.cmpi eq, %154, %155 : vector<8x128xi32>
    %cst_44 = arith.constant 0.000000e+00 : f32
    %157 = vector.shape_cast %33 : vector<8x1xf32> to vector<8x1xf32>
    %158 = vector.broadcast %157 : vector<8x1xf32> to vector<8x128xf32>
    %159 = vector.broadcast %cst_44 : f32 to vector<8x128xf32>
    %160 = arith.select %156, %158, %159 : vector<8x128xi1>, vector<8x128xf32>
    %c1_i32_45 = arith.constant 1 : i32
    %161 = vector.broadcast %c1_i32_45 : i32 to vector<8x128xi32>
    %162 = arith.cmpi eq, %154, %161 : vector<8x128xi32>
    %cst_46 = arith.constant 0.000000e+00 : f32
    %163 = vector.shape_cast %34 : vector<8x1xf32> to vector<8x1xf32>
    %164 = vector.broadcast %163 : vector<8x1xf32> to vector<8x128xf32>
    %165 = vector.broadcast %cst_46 : f32 to vector<8x128xf32>
    %166 = arith.select %162, %164, %165 : vector<8x128xi1>, vector<8x128xf32>
    %167 = arith.addf %160, %166 : vector<8x128xf32>
    %c2_i32_47 = arith.constant 2 : i32
    %168 = vector.broadcast %c2_i32_47 : i32 to vector<8x128xi32>
    %169 = arith.cmpi eq, %154, %168 : vector<8x128xi32>
    %cst_48 = arith.constant 0.000000e+00 : f32
    %170 = vector.shape_cast %153 : vector<8x1xf32> to vector<8x1xf32>
    %171 = vector.broadcast %170 : vector<8x1xf32> to vector<8x128xf32>
    %172 = vector.broadcast %cst_48 : f32 to vector<8x128xf32>
    %173 = arith.select %169, %171, %172 : vector<8x128xi1>, vector<8x128xf32>
    %174 = arith.addf %167, %173 : vector<8x128xf32>
    %c3_i32_49 = arith.constant 3 : i32
    %175 = vector.broadcast %c3_i32_49 : i32 to vector<8x128xi32>
    %176 = arith.cmpi eq, %154, %175 : vector<8x128xi32>
    %cst_50 = arith.constant 0.000000e+00 : f32
    %177 = vector.shape_cast %77 : vector<1x1xf32> to vector<1x1xf32>
    %178 = vector.broadcast %177 : vector<1x1xf32> to vector<8x128xf32>
    %179 = vector.broadcast %cst_50 : f32 to vector<8x128xf32>
    %180 = arith.select %176, %178, %179 : vector<8x128xi1>, vector<8x128xf32>
    %181 = arith.addf %174, %180 : vector<8x128xf32>
    %c0_51 = arith.constant 0 : index
    %c0_52 = arith.constant 0 : index
    %182 = vector.load %arg5[%c0_51, %c0_52] : memref<8x128xf32, #tpu.memory_space<vmem>>, vector<8x128xf32>
    tpu.vector_store %arg5[%c0_51, %c0_52], %181 {strides = array<i32>} : memref<8x128xf32, #tpu.memory_space<vmem>>, vector<8x128xf32>,
    return
  }
}

</mosaic_0001>

<bundles_post_ra>
// kernel: bert_prompt_tune_forward.1
= control target key start
LH: loop header
LB: loop body
LE: loop exit
PB: predicated region body
PF: predicated region fallthrough
CT: control target
= control target key end

     0   :  { %10 = vsyncpa [#allocation3], 0  ;;  %s459_s0 = inlined_call_operand.vmem [shape: f32[8,32], index: 0, kind: input, shape index: {}]   ;;  %s460_s1 = inlined_call_operand.vmem [shape: f32[32,128], index: 1, kind: input, shape index: {}]   ;;  %s461_s2 = inlined_call_operand.vmem [shape: f32[8,128], index: 2, kind: input, shape index: {}]   ;;  %s462_s3 = inlined_call_operand.vmem [shape: f32[2,24,128], index: 3, kind: input, shape index: {}]   ;;  %s463_s4 = inlined_call_operand.vmem [shape: s32[6], index: 4, kind: input, shape index: {}]   ;;  %s464_s5 = inlined_call_operand.vmem [shape: f32[8,128], index: 5, kind: output, shape index: {}]  }
   0x1   :  { %s25_s20 = sshll.u32 %s463_s4, 4  ;;  %s26_s20 = int_to_ptr.vmem [resolvable:$true] %s25_s20 }
   0x2   :  { %s353_s21 = scalar_lea.vmem %s26_s20, 16  ;;  %p358_p1 = scmp.lt.s32.totalorder %s26_s20, %s26_s20 }
   0x3   :  { %p354_p0 = scmp.ne.s32.totalorder %s26_s20, %s353_s21  ;;  %p359_p2 = scmp.lt.s32.totalorder %s353_s21, %s353_s21 }
   0x5   :  { %p360_p3 = por %p359_p2, %p358_p1 }
   0x7   :  { %p361_p4 = pnand %p360_p3, %p354_p0 }
   0x9   :  { %364 = shalt.err (!%p361_p4)
}
   0xa   :  { %s367_s22 = smov [#allocation2]  }
   0xb   :  { %28 = dma.vmem_to_smem %s26_s20, 16, %s367_s22, [#allocation3]  }
   0xc   :  { %365 = dma.done.wait [#allocation3], 16  }
   0xd   :  { %366 = vsyncadd [#allocation3], 4294967280 }
   0xe   :  { %32 = sfence }
   0xf   :  { %v37_v0 = vld [vmem:[%s460_s1] sm:$0xff]  ;;  %v38_v1 = vld [vmem:[%s460_s1 + $0x8] sm:$0xff]  ;;  %v39_v2 = vld [vmem:[%s460_s1 + $0x10] sm:$0xff]  ;;  %v368_v3 = vmov 0.0|0.0   ;;  %vm369_vm0 = vmmov 0   ;;  %v370_v6 = vmov 0.0   ;;  %v168_v17 = vlaneseq }
  0x10   :  { %323 = vmatprep.subr.bf16.mxu0 %v368_v3  ;;  %v324_v4 = vpack.c.bf16 %v38_v1, %v37_v0  ;;  %v40_v5 = vld [vmem:[%s460_s1 + $0x18] sm:$0xff]  ;;  %320 = vmatprep.mubr.msk.f32.mxu0 %vm369_vm0, %v370_v6  ;;  %v36_v8 = vld [vmem:[%s459_s0] sm:$0xff]  ;;  %vm45_vm1 = vcmask 261120   ;;  %s199_s1 = sld [smem:[#allocation2]]  ;;  %s423_s9 = sld [smem:[#allocation2 + $0x1]]  ;;  %vm220_vm5 = vcmask 1042432  }
  0x11   :  { %v327_v7 = vpack.c.bf16 %v40_v5, %v39_v2  ;;  %v292_v9 = vld [vmem:[%s461_s2] ss:$0 sm:$0xff]  ;;  %s299_s0 = sld [smem:[#allocation2 + $0x2]]  ;;  %s303_s10 = sld [smem:[#allocation2 + $0x3]]  ;;  %v427_v18 = vand.u32 127, %v168_v17 }
  0x12   :  { %325 = vmatpush3.bf16.msra.mxu0 %v324_v4  ;;  %v294_v36 = vld [vmem:[%s461_s2 + $0x1] ss:$0 sm:$0xff]  ;;  %v295_v39 = vld [vmem:[%s461_s2 + $0x2] ss:$0 sm:$0xff]  ;;  %s296_s2 = sld [smem:[#allocation2 + $0x4]]  ;;  %s297_s29 = sld [smem:[#allocation2 + $0x5]] }
  0x13   :  { %326 = vmatprep.subr.bf16.mxu0 %v368_v3  ;;  %v198_v19 = vand.u32 7, %v427_v18  ;;  %vm270_vm12 = vcmp.eq.s32.totalorder %v427_v18, 0  ;;  %vm272_vm13 = vcmp.eq.s32.totalorder %v427_v18, 1  ;;  %vm275_vm14 = vcmp.eq.s32.totalorder %v427_v18, 2 }
  0x14   :  { %vm278_vm15 = vcmp.eq.s32.totalorder %v427_v18, 3 }
  0x16   :  { %328 = vmatpush3.bf16.msra.mxu0 %v327_v7  ;;  %s300_s11 = sadd.s32 4294967293, %s199_s1  ;;  %s304_s12 = sadd.s32 4294967293, %s423_s9 }
  0x17   :  { %s202_s13 = ssub.s32 %s300_s11, %s299_s0  ;;  %s237_s14 = ssub.s32 %s304_s12, %s303_s10 }
  0x18   :  { %p203_p5 = scmp.lt.s32.totalorder %s202_s13, 0  ;;  %p206_p6 = scmp.lt.s32.totalorder %s300_s11, 0 }
  0x19   :  { %321 = vmatmul.mubr.msk.f32.vlgmr.msra.gmra.mrb[0].mxu0 %vm45_vm1, %v36_v8  ;;  %s204_s15 = sadd.s32 8, %s202_s13  ;;  %s207_s16 = sadd.s32 5, %s199_s1 }
  0x1a   :  { %s466_s15 = smov (!%p203_p5, %s204_s15), %s202_s13  ;;  %s468_s16 = smov (!%p206_p6, %s207_s16), %s300_s11 }
  0x1b   :  { %v209_v20 = vstv %s466_s15  ;;  %s216_s17 = smul.u32 3, %s199_s1  ;;  %p238_p7 = scmp.lt.s32.totalorder %s237_s14, 0  ;;  %v211_v21 = vstv %s468_s16 }
  0x1c   :  { %vm210_vm2 = vcmp.ge.s32.totalorder %v198_v19, %v209_v20  ;;  %s239_s18 = sadd.s32 8, %s237_s14  ;;  %p241_p8 = scmp.lt.s32.totalorder %s304_s12, 0  ;;  %vm212_vm3 = vcmp.lt.s32.totalorder %v198_v19, %v211_v21 }
  0x1d   :  { %s217_s21 = scalar_lea.vmem %s462_s3, %s216_s17  ;;  %s242_s22 = sadd.s32 5, %s423_s9  ;;  %vm213_vm4 = vmand %vm210_vm2, %vm212_vm3 }
  0x1e   :  { %v218_v22 = vld [vmem:[%s217_s21] sm:$0x7]  ;;  %s470_s18 = smov (!%p238_p7, %s239_s18), %s237_s14  ;;  %v301_v23 = vsel %vm213_vm4, 1.0, %v370_v6  ;;  %s472_s22 = smov (!%p241_p8, %s242_s22), %s304_s12 }
  0x1f   :  { %v219_v24 = vmul.f32 %v301_v23, %v218_v22  ;;  %v244_v25 = vstv %s470_s18  ;;  %s289_s23 = smul.u32 3, %s423_s9  ;;  %v246_v26 = vstv %s472_s22 }
  0x20   :  { %vm245_vm6 = vcmp.ge.s32.totalorder %v198_v19, %v244_v25  ;;  %vm247_vm7 = vcmp.lt.s32.totalorder %v198_v19, %v246_v26 }
  0x21   :  { %v221_v27 = vsel %vm220_vm5, %v219_v24, 0.0  ;;  %s290_s26 = scalar_lea.vmem %s462_s3, %s289_s23  ;;  %vm248_vm8 = vmand %vm245_vm6, %vm247_vm7 }
  0x22   :  { %v306_v28 = vld [vmem:[%s290_s26 + $0x18] sm:$0x7]  ;;  %v305_v29 = vsel %vm248_vm8, 1.0, %v370_v6 }
  0x23   :  { %v255_v30 = vmul.f32 %v306_v28, %v305_v29 }
  0x25   :  { %v256_v31 = vsel %vm220_vm5, %v255_v30, 0.0 }
  0xec   :  { %v115_v10 = vpop.f32.mrb[0].mxu0 }
  0xed   :  { %v116_v11 = vadd.f32 %v292_v9, %v115_v10  ;;  %v322_v12 = vpop.f32.mrb[1].mxu0  ;;  %v169_v10 = vshrl.u32 %v168_v17, 7 }
  0xef   :  { %119 = vmax.xlane.f32.xlu0 %v116_v11  ;;  %vm170_vm9 = vcmp.eq.s32.totalorder %v169_v10, 0  ;;  %vm174_vm10 = vcmp.eq.s32.totalorder %v169_v10, 1  ;;  %vm185_vm11 = vcmp.lt.s32.totalorder %v169_v10, 2 }
  0xf0   :  { %v298_v30 = vsel %vm185_vm11, 1.0, %v370_v6 }
 0x17c   :  { %v120_v13 = vpop.xlane.xlu0 %119 }
 0x17d   :  { %v121_v14 = vsub.f32 %v116_v11, %v120_v13 }
 0x17f   :  { %v122_v15 = vmul.f32 1.442695, %v121_v14  ;;  %v172_v14 = vstv %s296_s2 }
 0x181   :  { %337 = vpow2.f32 %v122_v15  ;;  %v176_v15 = vstv %s297_s29 }
 0x182   :  { %v177_v19 = vsel %vm174_vm10, %v176_v15, 0 }
 0x18b   :  { %v338_v16 = vpop.eup %337 }
 0x18c   :  { %124 = vadd.xlane.f32.xlu0 %v338_v16  ;;  %v173_v16 = vsel %vm170_vm9, %v172_v14, 0 }
 0x18d   :  { %v178_v20 = vadd.s32 %v177_v19, %v173_v16 }
 0x18f   :  { %v179_v21 = vcvt.s32.f32 %v178_v20 }
 0x190   :  { %222 = vadd.xlane.f32.xlu0 %v221_v27 }
 0x191   :  { %v180_v25 = vsub.f32 1.0, %v179_v21 }
 0x219   :  { %v125_v32 = vpop.xlane.xlu0 %124 }
 0x21a   :  { %339 = vlog2.f32 %v125_v32 }
 0x21d   :  { %v223_v41 = vpop.xlane.xlu0 %222 }
 0x21e   :  { %v224_v42 = vrot.slane %v223_v41, 4 }
 0x220   :  { %v225_v43 = vadd.f32 %v224_v42, %v223_v41 }
 0x222   :  { %v226_v44 = vrot.slane %v225_v43, 2 }
 0x224   :  { %v340_v33 = vpop.eup %339  ;;  %v227_v45 = vadd.f32 %v226_v44, %v225_v43 }
 0x225   :  { %v127_v34 = vmul.f32 0.6931472, %v340_v33 }
 0x226   :  { %v228_v46 = vrot.slane %v227_v45, 1 }
 0x227   :  { %v128_v35 = vadd.f32 %v127_v34, %v120_v13 }
 0x228   :  { %v229_v47 = vadd.f32 %v228_v46, %v227_v45 }
 0x229   :  { %v129_v37 = vsub.f32 %v116_v11, %v128_v35 }
 0x22a   :  { %329 = vpush %v229_v47 }
 0x22b   :  { %v134_v38 = vmul.f32 %v294_v36, %v129_v37  ;;  %v141_v40 = vmul.f32 %v295_v39, %v129_v37 }
 0x22d   :  { %135 = vadd.xlane.f32.xlu1 %v134_v38 }
 0x231   :  { %142 = vadd.xlane.f32.xlu1 %v141_v40 }
 0x235   :  { %257 = vadd.xlane.f32.xlu1 %v256_v31 }
 0x25b   :  { %s330_s30 = spop %329 }
 0x25c   :  { %v231_v31 = vstv %s330_s30 }
 0x25d   :  { %v232_v35 = vsel %vm170_vm9, %v231_v31, 0.0 }
 0x2ba   :  { %v136_v48 = vpop.xlane.xlu1 %135 }
 0x2be   :  { %v143_v49 = vpop.xlane.xlu1 %142 }
 0x2bf   :  { %v144_v50 = vmax.f32 %v143_v49, %v136_v48 }
 0x2c1   :  { %v145_v51 = vsub.f32 %v143_v49, %v144_v50  ;;  %v148_v52 = vsub.f32 %v136_v48, %v144_v50 }
 0x2c2   :  { %v258_v53 = vpop.xlane.xlu1 %257 }
 0x2c3   :  { %v146_v54 = vmul.f32 1.442695, %v145_v51  ;;  %v149_v55 = vmul.f32 1.442695, %v148_v52  ;;  %v259_v56 = vrot.slane %v258_v53, 4 }
 0x2c5   :  { %341 = vpow2.f32 %v146_v54  ;;  %v260_v57 = vadd.f32 %v259_v56, %v258_v53 }
 0x2c6   :  { %343 = vpow2.f32 %v149_v55 }
 0x2c7   :  { %v261_v58 = vrot.slane %v260_v57, 2 }
 0x2c9   :  { %v262_v59 = vadd.f32 %v261_v58, %v260_v57 }
 0x2cb   :  { %v263_v60 = vrot.slane %v262_v59, 1 }
 0x2cd   :  { %v264_v61 = vadd.f32 %v263_v60, %v262_v59 }
 0x2cf   :  { %v342_v62 = vpop.eup %341  ;;  %331 = vpush %v264_v61 }
 0x2d0   :  { %v344_v63 = vpop.eup %343 }
 0x2d1   :  { %v151_v0 = vadd.f32 %v344_v63, %v342_v62 }
 0x2d3   :  { %345 = vrcp.f32 %v151_v0 }
 0x2dd   :  { %v346_v1 = vpop.eup %345 }
 0x2de   :  { %v153_v2 = vmul.f32 %v346_v1, %v342_v62  ;;  %v154_v3 = vmul.f32 %v346_v1, %v344_v63 }
 0x2e0   :  { %v155_v4 = vmax.f32 %v153_v2, %v154_v3  ;;  %v271_v43 = vsel %vm270_vm12, %v153_v2, 0.0  ;;  %v273_v44 = vsel %vm272_vm13, %v154_v3, 0.0 }
 0x2e1   :  { %v274_v47 = vadd.f32 %v273_v44, %v271_v43 }
 0x2e2   :  { %v156_v5 = vsub.f32 %v153_v2, %v155_v4  ;;  %v159_v7 = vsub.f32 %v154_v3, %v155_v4 }
 0x2e4   :  { %v157_v8 = vmul.f32 1.442695, %v156_v5  ;;  %v160_v9 = vmul.f32 1.442695, %v159_v7 }
 0x2e6   :  { %347 = vpow2.f32 %v157_v8 }
 0x2e7   :  { %349 = vpow2.f32 %v160_v9 }
 0x2f0   :  { %v348_v11 = vpop.eup %347 }
 0x2f1   :  { %v350_v12 = vpop.eup %349 }
 0x2f2   :  { %v162_v13 = vadd.f32 %v350_v12, %v348_v11 }
 0x2f4   :  { %351 = vlog2.f32 %v162_v13 }
 0x2fe   :  { %v352_v22 = vpop.eup %351 }
 0x2ff   :  { %v164_v23 = vmul.f32 0.6931472, %v352_v22 }
 0x300   :  { %s332_s6 = spop %331 }
 0x301   :  { %v165_v24 = vadd.f32 %v164_v23, %v155_v4  ;;  %v266_v33 = vstv %s332_s6 }
 0x302   :  { %v267_v36 = vsel %vm174_vm10, %v266_v33, 0.0 }
 0x303   :  { %v166_v26 = vsub.f32 %v153_v2, %v165_v24  ;;  %v167_v17 = vsub.f32 %v154_v3, %v165_v24  ;;  %v268_v39 = vadd.f32 %v267_v36, %v232_v35 }
 0x305   :  { %v181_v27 = vmul.f32 %v180_v25, %v166_v26  ;;  %v182_v28 = vmul.f32 %v179_v21, %v167_v17  ;;  %v269_v42 = vmul.f32 0.020833334, %v268_v39 }
 0x307   :  { %v183_v29 = vadd.f32 %v182_v28, %v181_v27  ;;  %v276_v46 = vsel %vm275_vm14, %v269_v42, 0.0 }
 0x308   :  { %v277_v49 = vadd.f32 %v276_v46, %v274_v47 }
 0x309   :  { %v184_v32 = vsub.f32 0.0, %v183_v29 }
 0x30b   :  { %v188_v34 = vmul.f32 %v298_v30, %v184_v32 }
 0x30d   :  { %v189_v37 = vrot.slane %v188_v34, 4 }
 0x30f   :  { %v190_v38 = vadd.f32 %v189_v37, %v188_v34 }
 0x311   :  { %v191_v40 = vrot.slane %v190_v38, 2 }
 0x313   :  { %v192_v41 = vadd.f32 %v191_v40, %v190_v38 }
 0x315   :  { %v193_v6 = vrot.slane %v192_v41, 1 }
 0x317   :  { %v194_v45 = vadd.f32 %v193_v6, %v192_v41 }
 0x319   :  { %v195_v48 = vmul.f32 0.5, %v194_v45 }
 0x31b   :  { %v279_v50 = vsel %vm278_vm15, %v195_v48, 0.0 }
 0x31c   :  { %v280_v51 = vadd.f32 %v279_v50, %v277_v49 }
 0x31e   :  { %281 = vst [vmem:[%s464_s5] sm:$0xff] %v280_v51 }
 0x31f   :  { %286 = vsyncpa [#allocation3], 1 }

</bundles_post_ra>
